<compile_context>
chip_gen: v7x
topology: tpu7x:2x2x1
jax: 0.10.0
libtpu: 0.0.40
codegen_flags: <defaults>
</compile_context>

<pallas_src>
import jax
import jax.numpy as jnp
from jax import lax
from jax.experimental import pallas as pl
from jax.experimental.pallas import tpu as pltpu

LANE = 128


# ---------------------------------------------------------------------------
# Fused Pallas kernel: all GraphConv layers + ReLU + BN + max readout +
# prediction Linear + log_softmax in one gridless pallas_call.
# ---------------------------------------------------------------------------
def _make_fused_kernel(num_conv_layers):
    nconv = num_conv_layers

    def _mean_0_2(t):
        # mean over axes (0, 2) with keepdims, as chained single-axis reduces
        # (Mosaic-friendly).
        s = jnp.sum(t, axis=2, keepdims=True)    # (B, N, 1)
        s = jnp.sum(s, axis=0, keepdims=True)    # (1, N, 1)
        return s / float(t.shape[0] * t.shape[2])

    def kernel(x_ref, adj_ref, *refs):
        # refs layout: [w0, ws0, b0, ..., w_{L-1}, ws_{L-1}, b_{L-1},
        #               pred_w, pred_b, out_ref]
        conv_refs = refs[: 3 * nconv]
        pred_w_ref, pred_b_ref, out_ref = refs[3 * nconv:]

        h = x_ref[...]                       # (B, N, Din), f32
        adj = adj_ref[...]                   # (B, N, N)
        B, N, _ = h.shape

        readouts = []
        for l in range(nconv):
            w_ref, ws_ref, b_ref = conv_refs[3 * l: 3 * l + 3]
            w = w_ref[...]                   # (Din, Dout)
            ws = ws_ref[...]                 # (Din, Dout)
            bias_v = b_ref[...]              # (1, Dout)
            din = h.shape[-1]
            dout = w.shape[1]

            # adj @ h  (batched, MXU)
            agg = jnp.einsum('bij,bjd->bid', adj, h,
                             preferred_element_type=jnp.float32)

            # Flatten batch*nodes so the weight matmuls see B*N rows.
            h2 = h.reshape(B * N, din)
            agg2 = agg.reshape(B * N, din)
            y2 = jnp.dot(agg2, w, preferred_element_type=jnp.float32)
            y2 = y2 + jnp.dot(h2, ws, preferred_element_type=jnp.float32)
            y2 = y2 + bias_v
            y = y2.reshape(B, N, dout)

            # F.normalize(y, p=2, dim=2): y / max(||y||_2, 1e-12)
            # == y * rsqrt(max(||y||^2, 1e-24))   (rsqrt -> EUP slot)
            ssq = jnp.sum(y * y, axis=-1, keepdims=True)
            y = y * lax.rsqrt(jnp.maximum(ssq, 1e-24))

            if l < nconv - 1:
                # ReLU
                y = jnp.maximum(y, 0.0)
                # Fresh training-mode BatchNorm1d over node channels:
                # batch stats over dims (0, 2), biased variance, eps=1e-5,
                # gamma=1 / beta=0.
                mean = _mean_0_2(y)
                var = _mean_0_2((y - mean) ** 2)
                y = (y - mean) * lax.rsqrt(var + 1e-5)

            # graph readout: max over nodes (dim=1)
            readouts.append(jnp.max(y, axis=1))
            h = y

        out = jnp.concatenate(readouts, axis=1)           # (B, pred_input_dim)

        # Prediction Linear (lane-padded to 128) + log_softmax(dim=1).
        logits = jnp.dot(out, pred_w_ref[...],
                         preferred_element_type=jnp.float32) + pred_b_ref[...]
        m = jnp.max(logits, axis=-1, keepdims=True)
        z = logits - m
        lse = jnp.log(jnp.sum(jnp.exp(z), axis=-1, keepdims=True))
        out_ref[...] = z - lse

    return kernel


def gcn_encoder_forward(x, adj, params):
    conv_layers = [params["conv_first"], *params["conv_block"], params["conv_last"]]
    nconv = len(conv_layers)
    B, N, _ = x.shape

    # Lane-dense prediction head: pad label dim to 128 lanes.  Padded columns
    # get weight 0 and bias -1e30 so they contribute nothing to the softmax.
    pred_w = params["pred_w"]
    pred_b = params["pred_b"]
    P, L = pred_w.shape
    l_pad = max(LANE, ((L + LANE - 1) // LANE) * LANE)
    pred_w_pad = jnp.zeros((P, l_pad), jnp.float32).at[:, :L].set(pred_w)
    pred_b_pad = jnp.full((1, l_pad), -1e30, jnp.float32).at[0, :L].set(pred_b)

    flat_conv = []
    for (w, ws, b) in conv_layers:
        flat_conv += [w, ws, b.reshape(1, -1)]

    n_inputs = 2 + len(flat_conv) + 2
    vmem_spec = lambda: pl.BlockSpec(memory_space=pltpu.MemorySpace.VMEM)

    out_pad = pl.pallas_call(
        _make_fused_kernel(nconv),
        out_shape=jax.ShapeDtypeStruct((B, l_pad), jnp.float32),
        in_specs=[vmem_spec() for _ in range(n_inputs)],
        out_specs=vmem_spec(),
    )(x, adj, *flat_conv, pred_w_pad, pred_b_pad)

    return out_pad[:, :L]


# ---------------------------------------------------------------------------
# Pure-JAX reference (mirrors the PyTorch forward) for a correctness check.
# ---------------------------------------------------------------------------
def gcn_encoder_forward_ref(x, adj, params):
    def conv(h, layer):
        w, ws, b = layer
        y = jnp.einsum('bij,bjd->bid', adj, h) @ w + h @ ws + b
        n = jnp.sqrt(jnp.sum(y * y, axis=-1, keepdims=True))
        return y / jnp.maximum(n, 1e-12)

    def bn(h):
        m = jnp.mean(h, axis=(0, 2), keepdims=True)
        v = jnp.mean((h - m) ** 2, axis=(0, 2), keepdims=True)
        return (h - m) / jnp.sqrt(v + 1e-5)

    h = bn(jax.nn.relu(conv(x, params["conv_first"])))
    outs = [jnp.max(h, axis=1)]
    for lp in params["conv_block"]:
        h = bn(jax.nn.relu(conv(h, lp)))
        outs.append(jnp.max(h, axis=1))
    h = conv(h, params["conv_last"])
    outs.append(jnp.max(h, axis=1))
    out = jnp.concatenate(outs, axis=1)
    logits = out @ params["pred_w"] + params["pred_b"]
    return jax.nn.log_softmax(logits, axis=1)


# ---------------------------------------------------------------------------
# Deterministic parameter construction (shapes from GcnEncoderGraph.__init__)
# ---------------------------------------------------------------------------
def xavier_uniform(key, shape, gain):
    fan_in, fan_out = shape
    bound = gain * (6.0 / (fan_in + fan_out)) ** 0.5
    return jax.random.uniform(key, shape, jnp.float32, -bound, bound)


def build_params(key, input_dim, hidden_dim, embedding_dim, label_dim, num_layers):
    gain = 2.0 ** 0.5  # nn.init.calculate_gain('relu')
    keys = iter(jax.random.split(key, 4 * num_layers + 4))

    def conv_layer(din, dout):
        w = xavier_uniform(next(keys), (din, dout), gain)
        ws = xavier_uniform(next(keys), (din, dout), gain)   # self_weight (add_self)
        b = jnp.zeros((dout,), jnp.float32)                  # init.constant_(bias, 0.0)
        return (w, ws, b)

    params = {
        "conv_first": conv_layer(input_dim, hidden_dim),
        "conv_block": [conv_layer(hidden_dim, hidden_dim) for _ in range(num_layers - 2)],
        "conv_last": conv_layer(hidden_dim, embedding_dim),
    }
    pred_input_dim = hidden_dim * (num_layers - 1) + embedding_dim   # concat=True
    lim = 1.0 / (pred_input_dim ** 0.5)                              # PyTorch Linear default
    params["pred_w"] = jax.random.uniform(
        next(keys), (pred_input_dim, label_dim), jnp.float32, -lim, lim)
    params["pred_b"] = jax.random.uniform(
        next(keys), (label_dim,), jnp.float32, -lim, lim)
    return params


# ---------------------------------------------------------------------------
if __name__ == "__main__":
    B, N = 2, 16
    input_dim, hidden_dim, embedding_dim, label_dim, num_layers = 8, 32, 32, 6, 3

    key = jax.random.PRNGKey(0)
    k_x, k_adj, k_p = jax.random.split(key, 3)

    x = jax.random.normal(k_x, (B, N, input_dim), jnp.float32)
    adj = jax.random.uniform(k_adj, (B, N, N), jnp.float32)
    adj = 0.5 * (adj + jnp.transpose(adj, (0, 2, 1)))   # symmetric adjacency

    params = build_params(k_p, input_dim, hidden_dim, embedding_dim,
                          label_dim, num_layers)

    ypred = gcn_encoder_forward(x, adj, params)
    ypred = jax.block_until_ready(ypred)

    assert ypred.shape == (B, label_dim)
    # log_softmax rows must sum (in prob space) to ~1
    assert bool(jnp.allclose(jnp.sum(jnp.exp(ypred), axis=1), 1.0, atol=1e-4))
    # match the pure-JAX reference of the PyTorch forward
    yref = gcn_encoder_forward_ref(x, adj, params)
    assert bool(jnp.max(jnp.abs(ypred - yref)) < 1e-2)
    print("KERNEL_OK")
</pallas_src>

<mosaic_0001>
module attributes {stable_mosaic.version = 11 : i64} {
  func.func @kernel(%arg0: memref<2x16x8xf32, #tpu.memory_space<vmem>>, %arg1: memref<2x16x16xf32, #tpu.memory_space<vmem>>, %arg2: memref<8x32xf32, #tpu.memory_space<vmem>>, %arg3: memref<8x32xf32, #tpu.memory_space<vmem>>, %arg4: memref<1x32xf32, #tpu.memory_space<vmem>>, %arg5: memref<32x32xf32, #tpu.memory_space<vmem>>, %arg6: memref<32x32xf32, #tpu.memory_space<vmem>>, %arg7: memref<1x32xf32, #tpu.memory_space<vmem>>, %arg8: memref<32x32xf32, #tpu.memory_space<vmem>>, %arg9: memref<32x32xf32, #tpu.memory_space<vmem>>, %arg10: memref<1x32xf32, #tpu.memory_space<vmem>>, %arg11: memref<96x128xf32, #tpu.memory_space<vmem>>, %arg12: memref<1x128xf32, #tpu.memory_space<vmem>>, %arg13: memref<2x128xf32, #tpu.memory_space<vmem>>) attributes {dimension_semantics = [], scalar_prefetch = 0 : i64, scratch_operands = 0 : i64, tpu.core_type = #tpu.core_type<tc>} {
    %c0 = arith.constant 0 : index
    %c0_0 = arith.constant 0 : index
    %c0_1 = arith.constant 0 : index
    %0 = vector.load %arg0[%c0, %c0_0, %c0_1] : memref<2x16x8xf32, #tpu.memory_space<vmem>>, vector<2x16x8xf32>
    %c0_2 = arith.constant 0 : index
    %c0_3 = arith.constant 0 : index
    %c0_4 = arith.constant 0 : index
    %1 = vector.load %arg1[%c0_2, %c0_3, %c0_4] : memref<2x16x16xf32, #tpu.memory_space<vmem>>, vector<2x16x16xf32>
    %c0_5 = arith.constant 0 : index
    %c0_6 = arith.constant 0 : index
    %2 = vector.load %arg2[%c0_5, %c0_6] : memref<8x32xf32, #tpu.memory_space<vmem>>, vector<8x32xf32>
    %c0_7 = arith.constant 0 : index
    %c0_8 = arith.constant 0 : index
    %3 = vector.load %arg3[%c0_7, %c0_8] : memref<8x32xf32, #tpu.memory_space<vmem>>, vector<8x32xf32>
    %c0_9 = arith.constant 0 : index
    %c0_10 = arith.constant 0 : index
    %4 = vector.load %arg4[%c0_9, %c0_10] : memref<1x32xf32, #tpu.memory_space<vmem>>, vector<1x32xf32>
    "tpu.trace_start"() <{level = 10 : i32, message = "bij,bjd->bid"}> : () -> ()
    %cst = arith.constant dense<0.000000e+00> : vector<2x16x8xf32>
    %5 = tpu.matmul %1, %0, %cst {dimension_numbers = #tpu.dot_dimension_numbers<[2], [1], [1], [2], [0, 0, 0, 1, 1, 2], [0], [0]>} : vector<2x16x16xf32>, vector<2x16x8xf32>, vector<2x16x8xf32> -> vector<2x16x8xf32>
    "tpu.trace_stop"() : () -> ()
    %6 = vector.shape_cast %0 : vector<2x16x8xf32> to vector<32x8xf32>
    %7 = vector.shape_cast %5 : vector<2x16x8xf32> to vector<32x8xf32>
    %cst_11 = arith.constant dense<0.000000e+00> : vector<32x32xf32>
    %8 = tpu.matmul %7, %2, %cst_11 {dimension_numbers = #tpu.dot_dimension_numbers<[1], [0], [0], [1], [0, 0, 1, 1], [], []>} : vector<32x8xf32>, vector<8x32xf32>, vector<32x32xf32> -> vector<32x32xf32>
    %cst_12 = arith.constant dense<0.000000e+00> : vector<32x32xf32>
    %9 = tpu.matmul %6, %3, %cst_12 {dimension_numbers = #tpu.dot_dimension_numbers<[1], [0], [0], [1], [0, 0, 1, 1], [], []>} : vector<32x8xf32>, vector<8x32xf32>, vector<32x32xf32> -> vector<32x32xf32>
    %10 = arith.addf %8, %9 : vector<32x32xf32>
    %11 = vector.broadcast %4 : vector<1x32xf32> to vector<32x32xf32>
    %12 = arith.addf %10, %11 : vector<32x32xf32>
    %13 = vector.shape_cast %12 : vector<32x32xf32> to vector<2x16x32xf32>
    %14 = arith.mulf %13, %13 : vector<2x16x32xf32>
    %cst_13 = arith.constant dense<0.000000e+00> : vector<2x16xf32>
    %15 = vector.multi_reduction <add>, %14, %cst_13 [2] : vector<2x16x32xf32> to vector<2x16xf32>
    %16 = vector.shape_cast %15 : vector<2x16xf32> to vector<2x16x1xf32>
    %cst_14 = arith.constant 1.000000e-24 : f32
    %17 = vector.broadcast %cst_14 : f32 to vector<2x16x1xf32>
    %18 = arith.maximumf %16, %17 : vector<2x16x1xf32>
    %19 = math.rsqrt %18 : vector<2x16x1xf32>
    %20 = vector.broadcast %19 : vector<2x16x1xf32> to vector<2x16x32xf32>
    %21 = arith.mulf %13, %20 : vector<2x16x32xf32>
    %cst_15 = arith.constant 0.000000e+00 : f32
    %22 = vector.broadcast %cst_15 : f32 to vector<2x16x32xf32>
    %23 = arith.maximumf %21, %22 : vector<2x16x32xf32>
    %cst_16 = arith.constant dense<0.000000e+00> : vector<2x16xf32>
    %24 = vector.multi_reduction <add>, %23, %cst_16 [2] : vector<2x16x32xf32> to vector<2x16xf32>
    %25 = vector.shape_cast %24 : vector<2x16xf32> to vector<2x16x1xf32>
    %cst_17 = arith.constant dense<0.000000e+00> : vector<16x1xf32>
    %26 = vector.multi_reduction <add>, %25, %cst_17 [0] : vector<2x16x1xf32> to vector<16x1xf32>
    %27 = vector.shape_cast %26 : vector<16x1xf32> to vector<1x16x1xf32>
    %cst_18 = arith.constant 6.400000e+01 : f32
    %28 = vector.broadcast %cst_18 : f32 to vector<1x16x1xf32>
    %29 = arith.divf %27, %28 : vector<1x16x1xf32>
    %30 = vector.broadcast %29 : vector<1x16x1xf32> to vector<2x16x32xf32>
    %31 = arith.subf %23, %30 : vector<2x16x32xf32>
    %32 = arith.mulf %31, %31 : vector<2x16x32xf32>
    %cst_19 = arith.constant dense<0.000000e+00> : vector<2x16xf32>
    %33 = vector.multi_reduction <add>, %32, %cst_19 [2] : vector<2x16x32xf32> to vector<2x16xf32>
    %34 = vector.shape_cast %33 : vector<2x16xf32> to vector<2x16x1xf32>
    %cst_20 = arith.constant dense<0.000000e+00> : vector<16x1xf32>
    %35 = vector.multi_reduction <add>, %34, %cst_20 [0] : vector<2x16x1xf32> to vector<16x1xf32>
    %36 = vector.shape_cast %35 : vector<16x1xf32> to vector<1x16x1xf32>
    %cst_21 = arith.constant 6.400000e+01 : f32
    %37 = vector.broadcast %cst_21 : f32 to vector<1x16x1xf32>
    %38 = arith.divf %36, %37 : vector<1x16x1xf32>
    %39 = vector.broadcast %29 : vector<1x16x1xf32> to vector<2x16x32xf32>
    %40 = arith.subf %23, %39 : vector<2x16x32xf32>
    %cst_22 = arith.constant 9.99999974E-6 : f32
    %41 = vector.broadcast %cst_22 : f32 to vector<1x16x1xf32>
    %42 = arith.addf %38, %41 : vector<1x16x1xf32>
    %43 = math.rsqrt %42 : vector<1x16x1xf32>
    %44 = vector.broadcast %43 : vector<1x16x1xf32> to vector<2x16x32xf32>
    %45 = arith.mulf %40, %44 : vector<2x16x32xf32>
    %cst_23 = arith.constant dense<0xFF800000> : vector<2x32xf32>
    %46 = vector.multi_reduction <maximumf>, %45, %cst_23 [1] : vector<2x16x32xf32> to vector<2x32xf32>
    %c0_24 = arith.constant 0 : index
    %c0_25 = arith.constant 0 : index
    %47 = vector.load %arg5[%c0_24, %c0_25] : memref<32x32xf32, #tpu.memory_space<vmem>>, vector<32x32xf32>
    %c0_26 = arith.constant 0 : index
    %c0_27 = arith.constant 0 : index
    %48 = vector.load %arg6[%c0_26, %c0_27] : memref<32x32xf32, #tpu.memory_space<vmem>>, vector<32x32xf32>
    %c0_28 = arith.constant 0 : index
    %c0_29 = arith.constant 0 : index
    %49 = vector.load %arg7[%c0_28, %c0_29] : memref<1x32xf32, #tpu.memory_space<vmem>>, vector<1x32xf32>
    "tpu.trace_start"() <{level = 10 : i32, message = "bij,bjd->bid"}> : () -> ()
    %cst_30 = arith.constant dense<0.000000e+00> : vector<2x16x32xf32>
    %50 = tpu.matmul %1, %45, %cst_30 {dimension_numbers = #tpu.dot_dimension_numbers<[2], [1], [1], [2], [0, 0, 0, 1, 1, 2], [0], [0]>} : vector<2x16x16xf32>, vector<2x16x32xf32>, vector<2x16x32xf32> -> vector<2x16x32xf32>
    "tpu.trace_stop"() : () -> ()
    %51 = vector.shape_cast %45 : vector<2x16x32xf32> to vector<32x32xf32>
    %52 = vector.shape_cast %50 : vector<2x16x32xf32> to vector<32x32xf32>
    %cst_31 = arith.constant dense<0.000000e+00> : vector<32x32xf32>
    %53 = tpu.matmul %52, %47, %cst_31 {dimension_numbers = #tpu.dot_dimension_numbers<[1], [0], [0], [1], [0, 0, 1, 1], [], []>} : vector<32x32xf32>, vector<32x32xf32>, vector<32x32xf32> -> vector<32x32xf32>
    %cst_32 = arith.constant dense<0.000000e+00> : vector<32x32xf32>
    %54 = tpu.matmul %51, %48, %cst_32 {dimension_numbers = #tpu.dot_dimension_numbers<[1], [0], [0], [1], [0, 0, 1, 1], [], []>} : vector<32x32xf32>, vector<32x32xf32>, vector<32x32xf32> -> vector<32x32xf32>
    %55 = arith.addf %53, %54 : vector<32x32xf32>
    %56 = vector.broadcast %49 : vector<1x32xf32> to vector<32x32xf32>
    %57 = arith.addf %55, %56 : vector<32x32xf32>
    %58 = vector.shape_cast %57 : vector<32x32xf32> to vector<2x16x32xf32>
    %59 = arith.mulf %58, %58 : vector<2x16x32xf32>
    %cst_33 = arith.constant dense<0.000000e+00> : vector<2x16xf32>
    %60 = vector.multi_reduction <add>, %59, %cst_33 [2] : vector<2x16x32xf32> to vector<2x16xf32>
    %61 = vector.shape_cast %60 : vector<2x16xf32> to vector<2x16x1xf32>
    %cst_34 = arith.constant 1.000000e-24 : f32
    %62 = vector.broadcast %cst_34 : f32 to vector<2x16x1xf32>
    %63 = arith.maximumf %61, %62 : vector<2x16x1xf32>
    %64 = math.rsqrt %63 : vector<2x16x1xf32>
    %65 = vector.broadcast %64 : vector<2x16x1xf32> to vector<2x16x32xf32>
    %66 = arith.mulf %58, %65 : vector<2x16x32xf32>
    %cst_35 = arith.constant 0.000000e+00 : f32
    %67 = vector.broadcast %cst_35 : f32 to vector<2x16x32xf32>
    %68 = arith.maximumf %66, %67 : vector<2x16x32xf32>
    %cst_36 = arith.constant dense<0.000000e+00> : vector<2x16xf32>
    %69 = vector.multi_reduction <add>, %68, %cst_36 [2] : vector<2x16x32xf32> to vector<2x16xf32>
    %70 = vector.shape_cast %69 : vector<2x16xf32> to vector<2x16x1xf32>
    %cst_37 = arith.constant dense<0.000000e+00> : vector<16x1xf32>
    %71 = vector.multi_reduction <add>, %70, %cst_37 [0] : vector<2x16x1xf32> to vector<16x1xf32>
    %72 = vector.shape_cast %71 : vector<16x1xf32> to vector<1x16x1xf32>
    %cst_38 = arith.constant 6.400000e+01 : f32
    %73 = vector.broadcast %cst_38 : f32 to vector<1x16x1xf32>
    %74 = arith.divf %72, %73 : vector<1x16x1xf32>
    %75 = vector.broadcast %74 : vector<1x16x1xf32> to vector<2x16x32xf32>
    %76 = arith.subf %68, %75 : vector<2x16x32xf32>
    %77 = arith.mulf %76, %76 : vector<2x16x32xf32>
    %cst_39 = arith.constant dense<0.000000e+00> : vector<2x16xf32>
    %78 = vector.multi_reduction <add>, %77, %cst_39 [2] : vector<2x16x32xf32> to vector<2x16xf32>
    %79 = vector.shape_cast %78 : vector<2x16xf32> to vector<2x16x1xf32>
    %cst_40 = arith.constant dense<0.000000e+00> : vector<16x1xf32>
    %80 = vector.multi_reduction <add>, %79, %cst_40 [0] : vector<2x16x1xf32> to vector<16x1xf32>
    %81 = vector.shape_cast %80 : vector<16x1xf32> to vector<1x16x1xf32>
    %cst_41 = arith.constant 6.400000e+01 : f32
    %82 = vector.broadcast %cst_41 : f32 to vector<1x16x1xf32>
    %83 = arith.divf %81, %82 : vector<1x16x1xf32>
    %84 = vector.broadcast %74 : vector<1x16x1xf32> to vector<2x16x32xf32>
    %85 = arith.subf %68, %84 : vector<2x16x32xf32>
    %cst_42 = arith.constant 9.99999974E-6 : f32
    %86 = vector.broadcast %cst_42 : f32 to vector<1x16x1xf32>
    %87 = arith.addf %83, %86 : vector<1x16x1xf32>
    %88 = math.rsqrt %87 : vector<1x16x1xf32>
    %89 = vector.broadcast %88 : vector<1x16x1xf32> to vector<2x16x32xf32>
    %90 = arith.mulf %85, %89 : vector<2x16x32xf32>
    %cst_43 = arith.constant dense<0xFF800000> : vector<2x32xf32>
    %91 = vector.multi_reduction <maximumf>, %90, %cst_43 [1] : vector<2x16x32xf32> to vector<2x32xf32>
    %c0_44 = arith.constant 0 : index
    %c0_45 = arith.constant 0 : index
    %92 = vector.load %arg8[%c0_44, %c0_45] : memref<32x32xf32, #tpu.memory_space<vmem>>, vector<32x32xf32>
    %c0_46 = arith.constant 0 : index
    %c0_47 = arith.constant 0 : index
    %93 = vector.load %arg9[%c0_46, %c0_47] : memref<32x32xf32, #tpu.memory_space<vmem>>, vector<32x32xf32>
    %c0_48 = arith.constant 0 : index
    %c0_49 = arith.constant 0 : index
    %94 = vector.load %arg10[%c0_48, %c0_49] : memref<1x32xf32, #tpu.memory_space<vmem>>, vector<1x32xf32>
    "tpu.trace_start"() <{level = 10 : i32, message = "bij,bjd->bid"}> : () -> ()
    %cst_50 = arith.constant dense<0.000000e+00> : vector<2x16x32xf32>
    %95 = tpu.matmul %1, %90, %cst_50 {dimension_numbers = #tpu.dot_dimension_numbers<[2], [1], [1], [2], [0, 0, 0, 1, 1, 2], [0], [0]>} : vector<2x16x16xf32>, vector<2x16x32xf32>, vector<2x16x32xf32> -> vector<2x16x32xf32>
    "tpu.trace_stop"() : () -> ()
    %96 = vector.shape_cast %90 : vector<2x16x32xf32> to vector<32x32xf32>
    %97 = vector.shape_cast %95 : vector<2x16x32xf32> to vector<32x32xf32>
    %cst_51 = arith.constant dense<0.000000e+00> : vector<32x32xf32>
    %98 = tpu.matmul %97, %92, %cst_51 {dimension_numbers = #tpu.dot_dimension_numbers<[1], [0], [0], [1], [0, 0, 1, 1], [], []>} : vector<32x32xf32>, vector<32x32xf32>, vector<32x32xf32> -> vector<32x32xf32>
    %cst_52 = arith.constant dense<0.000000e+00> : vector<32x32xf32>
    %99 = tpu.matmul %96, %93, %cst_52 {dimension_numbers = #tpu.dot_dimension_numbers<[1], [0], [0], [1], [0, 0, 1, 1], [], []>} : vector<32x32xf32>, vector<32x32xf32>, vector<32x32xf32> -> vector<32x32xf32>
    %100 = arith.addf %98, %99 : vector<32x32xf32>
    %101 = vector.broadcast %94 : vector<1x32xf32> to vector<32x32xf32>
    %102 = arith.addf %100, %101 : vector<32x32xf32>
    %103 = vector.shape_cast %102 : vector<32x32xf32> to vector<2x16x32xf32>
    %104 = arith.mulf %103, %103 : vector<2x16x32xf32>
    %cst_53 = arith.constant dense<0.000000e+00> : vector<2x16xf32>
    %105 = vector.multi_reduction <add>, %104, %cst_53 [2] : vector<2x16x32xf32> to vector<2x16xf32>
    %106 = vector.shape_cast %105 : vector<2x16xf32> to vector<2x16x1xf32>
    %cst_54 = arith.constant 1.000000e-24 : f32
    %107 = vector.broadcast %cst_54 : f32 to vector<2x16x1xf32>
    %108 = arith.maximumf %106, %107 : vector<2x16x1xf32>
    %109 = math.rsqrt %108 : vector<2x16x1xf32>
    %110 = vector.broadcast %109 : vector<2x16x1xf32> to vector<2x16x32xf32>
    %111 = arith.mulf %103, %110 : vector<2x16x32xf32>
    %cst_55 = arith.constant dense<0xFF800000> : vector<2x32xf32>
    %112 = vector.multi_reduction <maximumf>, %111, %cst_55 [1] : vector<2x16x32xf32> to vector<2x32xf32>
    %113 = tpu.concatenate %46, %91, %112 in 1 : vector<2x32xf32>, vector<2x32xf32>, vector<2x32xf32> -> vector<2x96xf32>
    %c0_56 = arith.constant 0 : index
    %c0_57 = arith.constant 0 : index
    %114 = vector.load %arg11[%c0_56, %c0_57] : memref<96x128xf32, #tpu.memory_space<vmem>>, vector<96x128xf32>
    %cst_58 = arith.constant dense<0.000000e+00> : vector<2x128xf32>
    %115 = tpu.matmul %113, %114, %cst_58 {dimension_numbers = #tpu.dot_dimension_numbers<[1], [0], [0], [1], [0, 0, 1, 1], [], []>} : vector<2x96xf32>, vector<96x128xf32>, vector<2x128xf32> -> vector<2x128xf32>
    %c0_59 = arith.constant 0 : index
    %c0_60 = arith.constant 0 : index
    %116 = vector.load %arg12[%c0_59, %c0_60] : memref<1x128xf32, #tpu.memory_space<vmem>>, vector<1x128xf32>
    %117 = vector.broadcast %116 : vector<1x128xf32> to vector<2x128xf32>
    %118 = arith.addf %115, %117 : vector<2x128xf32>
    %cst_61 = arith.constant dense<0xFF800000> : vector<2xf32>
    %119 = vector.multi_reduction <maximumf>, %118, %cst_61 [1] : vector<2x128xf32> to vector<2xf32>
    %120 = vector.shape_cast %119 : vector<2xf32> to vector<2x1xf32>
    %121 = vector.broadcast %120 : vector<2x1xf32> to vector<2x128xf32>
    %122 = arith.subf %118, %121 : vector<2x128xf32>
    %123 = math.exp %122 : vector<2x128xf32>
    %cst_62 = arith.constant dense<0.000000e+00> : vector<2xf32>
    %124 = vector.multi_reduction <add>, %123, %cst_62 [1] : vector<2x128xf32> to vector<2xf32>
    %125 = vector.shape_cast %124 : vector<2xf32> to vector<2x1xf32>
    %126 = math.log %125 : vector<2x1xf32>
    %127 = vector.broadcast %126 : vector<2x1xf32> to vector<2x128xf32>
    %128 = arith.subf %122, %127 : vector<2x128xf32>
    %c0_63 = arith.constant 0 : index
    %c0_64 = arith.constant 0 : index
    %129 = vector.load %arg13[%c0_63, %c0_64] : memref<2x128xf32, #tpu.memory_space<vmem>>, vector<2x128xf32>
    tpu.vector_store %arg13[%c0_63, %c0_64], %128 {strides = array<i32>} : memref<2x128xf32, #tpu.memory_space<vmem>>, vector<2x128xf32>,
    return
  }
}

</mosaic_0001>

<bundles_post_ra>
// kernel: tpu_custom_call.1
= control target key start
LH: loop header
LB: loop body
LE: loop exit
PB: predicated region body
PF: predicated region fallthrough
CT: control target
= control target key end

     0   :  { %18 = vsyncpa [#allocation3], 0  ;;  %s2524_s0 = inlined_call_operand.vmem [shape: f32[2,16,8], index: 0, kind: input, shape index: {}]   ;;  %s2525_s1 = inlined_call_operand.vmem [shape: f32[2,16,16], index: 1, kind: input, shape index: {}]   ;;  %s2526_s2 = inlined_call_operand.hbm [shape: f32[8,32], index: 2, kind: input, shape index: {}]   ;;  %s2527_s3 = inlined_call_operand.hbm [shape: f32[8,32], index: 3, kind: input, shape index: {}]   ;;  %s2528_s4 = inlined_call_operand.vmem [shape: f32[1,32], index: 4, kind: input, shape index: {}]   ;;  %s2529_s5 = inlined_call_operand.vmem [shape: f32[32,32], index: 5, kind: input, shape index: {}]   ;;  %s2530_s6 = inlined_call_operand.hbm [shape: f32[32,32], index: 6, kind: input, shape index: {}]   ;;  %s2531_s7 = inlined_call_operand.vmem [shape: f32[1,32], index: 7, kind: input, shape index: {}]   ;;  %s2532_s8 = inlined_call_operand.hbm [shape: f32[32,32], index: 8, kind: input, shape index: {}]   ;;  %s2533_s9 = inlined_call_operand.hbm [shape: f32[32,32], index: 9, kind: input, shape index: {}]   ;;  %s2534_s10 = inlined_call_operand.vmem [shape: f32[1,32], index: 10, kind: input, shape index: {}]   ;;  %s2535_s11 = inlined_call_operand.hbm [shape: f32[96,128], index: 11, kind: input, shape index: {}]   ;;  %s2536_s12 = inlined_call_operand.vmem [shape: f32[1,128], index: 12, kind: input, shape index: {}]   ;;  %s2537_s13 = inlined_call_operand.hbm [shape: f32[2,128], index: 13, kind: output, shape index: {}]  }
   0x1   :  { %19 = vsyncpa [#allocation6], 0 }
   0x2   :  { %20 = vsyncpa [#allocation9], 0 }
   0x3   :  { %21 = vsyncpa [#allocation12], 0 }
   0x4   :  { %22 = vsyncpa [#allocation4], 0  ;;  %s2178_s25 = smov [#allocation5]   ;;  %s2014_s29 = scalar_lea.hbm %s2527_s3, 128 }
   0x5   :  { %s43_s26 = sshll.u32 %s2178_s25, 4  ;;  %p2015_p0 = scmp.ne.s32.totalorder %s2527_s3, %s2014_s29  ;;  %s44_s26 = int_to_ptr.vmem [resolvable:$true] %s43_s26 }
   0x6   :  { %p2018_p1 = scmp.lt.u32.totalorder %s2014_s29, %s2527_s3 }
   0x8   :  { %p2020_p2 = pnand %p2018_p1, %p2015_p0 }
   0xa   :  { %2023 = shalt.err (!%p2020_p2)
}
   0xb   :  { %s2024_s17 = scalar_lea.vmem %s44_s26, 128  ;;  %p2029_p4 = scmp.lt.s32.totalorder %s44_s26, %s44_s26 }
   0xc   :  { %p2025_p3 = scmp.ne.s32.totalorder %s44_s26, %s2024_s17  ;;  %p2030_p5 = scmp.lt.s32.totalorder %s2024_s17, %s2024_s17 }
   0xe   :  { %p2031_p6 = por %p2030_p5, %p2029_p4 }
  0x10   :  { %p2032_p7 = pnand %p2031_p6, %p2025_p3 }
  0x12   :  { %2035 = shalt.err (!%p2032_p7)
}
  0x13   :  { %46 = dma.hbm_to_vmem [thread:$0]  %s2527_s3, 128, %s44_s26, [#allocation6]  }
  0x14   :  { %s2179_s20 = smov [#allocation8]   ;;  %s2180_s22 = smov [#allocation2]  }
  0x15   :  { %s70_s21 = sshll.u32 %s2179_s20, 4  ;;  %s33_s23 = sshll.u32 %s2180_s22, 4  ;;  %s71_s21 = int_to_ptr.vmem [resolvable:$true] %s70_s21  ;;  %s34_s23 = int_to_ptr.vmem [resolvable:$true] %s33_s23 }
  0x16   :  { %s2036_s27 = scalar_lea.hbm %s2532_s8, 512 }
  0x17   :  { %p2037_p8 = scmp.ne.s32.totalorder %s2532_s8, %s2036_s27  ;;  %p2040_p9 = scmp.lt.u32.totalorder %s2036_s27, %s2532_s8 }
  0x19   :  { %p2042_p10 = pnand %p2040_p9, %p2037_p8 }
  0x1b   :  { %2045 = shalt.err (!%p2042_p10)
}
  0x1c   :  { %s2046_s3 = scalar_lea.vmem %s71_s21, 512  ;;  %p2051_p12 = scmp.lt.s32.totalorder %s71_s21, %s71_s21 }
  0x1d   :  { %p2047_p11 = scmp.ne.s32.totalorder %s71_s21, %s2046_s3  ;;  %p2052_p13 = scmp.lt.s32.totalorder %s2046_s3, %s2046_s3 }
  0x1f   :  { %p2053_p0 = por %p2052_p13, %p2051_p12 }
  0x21   :  { %p2054_p1 = pnand %p2053_p0, %p2047_p11 }
  0x23   :  { %2057 = shalt.err (!%p2054_p1)
}
  0x24   :  { %s2181_s26 = smov 128   ;;  %s2182_s15 = smov 8  }
  0x25   :  { %76 = dma.hbm_to_vmem [thread:$0]  %s2532_s8, 512, %s71_s21, [#allocation9], %s2181_s26, %s2181_s26, %s2182_s15  }
  0x26   :  { %s2058_s20 = scalar_lea.hbm %s2526_s2, 128 }
  0x27   :  { %p2059_p2 = scmp.ne.s32.totalorder %s2526_s2, %s2058_s20  ;;  %p2062_p3 = scmp.lt.u32.totalorder %s2058_s20, %s2526_s2 }
  0x29   :  { %p2064_p4 = pnand %p2062_p3, %p2059_p2 }
  0x2b   :  { %2067 = shalt.err (!%p2064_p4)
}
  0x2c   :  { %s2068_s28 = scalar_lea.vmem %s34_s23, 128  ;;  %p2073_p6 = scmp.lt.s32.totalorder %s34_s23, %s34_s23 }
  0x2d   :  { %p2069_p5 = scmp.ne.s32.totalorder %s34_s23, %s2068_s28  ;;  %p2074_p7 = scmp.lt.s32.totalorder %s2068_s28, %s2068_s28 }
  0x2f   :  { %p2075_p8 = por %p2074_p7, %p2073_p6 }
  0x31   :  { %p2076_p9 = pnand %p2075_p8, %p2069_p5 }
  0x33   :  { %2079 = shalt.err (!%p2076_p9)
}
  0x34   :  { %36 = dma.hbm_to_vmem [thread:$0]  %s2526_s2, 128, %s34_s23, [#allocation3]  }
  0x35   :  { %s2183_s29 = smov [#allocation7]   ;;  %s2184_s14 = smov [#allocation10]  }
  0x36   :  { %s56_s30 = sshll.u32 %s2183_s29, 4  ;;  %s82_s3 = sshll.u32 %s2184_s14, 4  ;;  %s57_s30 = int_to_ptr.vmem [resolvable:$true] %s56_s30  ;;  %s83_s3 = int_to_ptr.vmem [resolvable:$true] %s82_s3 }
  0x37   :  { %s2080_s18 = scalar_lea.hbm %s2530_s6, 512 }
  0x38   :  { %p2081_p10 = scmp.ne.s32.totalorder %s2530_s6, %s2080_s18  ;;  %p2084_p11 = scmp.lt.u32.totalorder %s2080_s18, %s2530_s6 }
  0x3a   :  { %p2086_p12 = pnand %p2084_p11, %p2081_p10 }
  0x3c   :  { %2089 = shalt.err (!%p2086_p12)
}
  0x3d   :  { %s2090_s2 = scalar_lea.vmem %s57_s30, 512  ;;  %p2095_p0 = scmp.lt.s32.totalorder %s57_s30, %s57_s30 }
  0x3e   :  { %p2091_p13 = scmp.ne.s32.totalorder %s57_s30, %s2090_s2  ;;  %p2096_p1 = scmp.lt.s32.totalorder %s2090_s2, %s2090_s2 }
  0x40   :  { %p2097_p2 = por %p2096_p1, %p2095_p0 }
  0x42   :  { %p2098_p3 = pnand %p2097_p2, %p2091_p13 }
  0x44   :  { %2101 = shalt.err (!%p2098_p3)
}
  0x45   :  { %62 = dma.hbm_to_vmem [thread:$0]  %s2530_s6, 512, %s57_s30, [#allocation6], %s2181_s26, %s2181_s26, %s2182_s15  }
  0x46   :  { %s2102_s8 = scalar_lea.hbm %s2533_s9, 512 }
  0x47   :  { %p2103_p4 = scmp.ne.s32.totalorder %s2533_s9, %s2102_s8  ;;  %p2106_p5 = scmp.lt.u32.totalorder %s2102_s8, %s2533_s9 }
  0x49   :  { %p2108_p6 = pnand %p2106_p5, %p2103_p4 }
  0x4b   :  { %2111 = shalt.err (!%p2108_p6)
}
  0x4c   :  { %s2112_s17 = scalar_lea.vmem %s83_s3, 512  ;;  %p2117_p8 = scmp.lt.s32.totalorder %s83_s3, %s83_s3 }
  0x4d   :  { %p2113_p7 = scmp.ne.s32.totalorder %s83_s3, %s2112_s17  ;;  %p2118_p9 = scmp.lt.s32.totalorder %s2112_s17, %s2112_s17 }
  0x4f   :  { %p2119_p10 = por %p2118_p9, %p2117_p8 }
  0x51   :  { %p2120_p11 = pnand %p2119_p10, %p2113_p7 }
  0x53   :  { %2123 = shalt.err (!%p2120_p11)
}
  0x54   :  { %88 = dma.hbm_to_vmem [thread:$0]  %s2533_s9, 512, %s83_s3, [#allocation9], %s2181_s26, %s2181_s26, %s2182_s15  }
  0x55   :  { %s2185_s18 = smov [#allocation11]   ;;  %s2124_s24 = scalar_lea.hbm %s2535_s11, 1536 }
  0x56   :  { %s96_s19 = sshll.u32 %s2185_s18, 4  ;;  %p2125_p12 = scmp.ne.s32.totalorder %s2535_s11, %s2124_s24  ;;  %s97_s19 = int_to_ptr.vmem [resolvable:$true] %s96_s19 }
  0x57   :  { %p2128_p13 = scmp.lt.u32.totalorder %s2124_s24, %s2535_s11 }
  0x59   :  { %p2130_p0 = pnand %p2128_p13, %p2125_p12 }
  0x5b   :  { %2133 = shalt.err (!%p2130_p0)
}
  0x5c   :  { %s2134_s28 = scalar_lea.vmem %s97_s19, 1536  ;;  %p2139_p2 = scmp.lt.s32.totalorder %s97_s19, %s97_s19 }
  0x5d   :  { %p2135_p1 = scmp.ne.s32.totalorder %s97_s19, %s2134_s28  ;;  %p2140_p3 = scmp.lt.s32.totalorder %s2134_s28, %s2134_s28 }
  0x5f   :  { %p2141_p4 = por %p2140_p3, %p2139_p2 }
  0x61   :  { %p2142_p5 = pnand %p2141_p4, %p2135_p1 }
  0x63   :  { %2145 = shalt.err (!%p2142_p5)
}
  0x64   :  { %102 = dma.hbm_to_vmem [thread:$0]  %s2535_s11, 1536, %s97_s19, [#allocation12], %s2181_s26, %s2181_s26, %s2182_s15  }
  0x65   :  { %2168 = dma.done.wait [#allocation3], 128  }
  0x66   :  { %2169 = vsyncadd [#allocation3], 4294967168 }
  0x67   :  { %2170 = dma.done.wait [#allocation6], 640  }
  0x68   :  { %2171 = vsyncadd [#allocation6], 4294966656 }
  0x69   :  { %2172 = dma.done.wait [#allocation9], 1024  }
  0x6a   :  { %2173 = vsyncadd [#allocation9], 4294966272 }
  0x6b   :  { %2174 = dma.done.wait [#allocation12], 1536  }
  0x6c   :  { %2175 = vsyncadd [#allocation12], 4294965760  ;;  %vm134_vm0 = vcmask 130048   ;;  %v123_v0 = vld [vmem:[%s2524_s0] sm:$0xff]  ;;  %v124_v1 = vld [vmem:[%s2524_s0 + $0x8] sm:$0xff]  ;;  %vm297_vm1 = vcmask 64512  }
  0x6d   :  { %v127_v2 = vld [vmem:[%s2525_s1] sm:$0xff]  ;;  %v1878_v3 = vpack.c.bf16 %v124_v1, %v123_v0  ;;  %v125_v4 = vld [vmem:[%s2524_s0 + $0x10] sm:$0xff]  ;;  %v126_v5 = vld [vmem:[%s2524_s0 + $0x18] sm:$0xff]  ;;  %vm506_vm2 = vcmask 261120   ;;  %vm1474_vm3 = vcmask 1041409   ;;  %vm2188_vm4 = vmmov 0  }
  0x6e   :  { %1741 = vmatprep.mubr.msk.f32.mxu0 %vm134_vm0, %v127_v2  ;;  %v1882_v6 = vpack.c.bf16 %v126_v5, %v125_v4  ;;  %v2365_v7 = vld [vmem:[%s2525_s1 + $0x10] sm:$0xff]  ;;  %v132_v8 = vld [vmem:[#allocation5] sm:$0xff]  ;;  %v2377_v10 = vld [vmem:[%s2525_s1 + $0x18] sm:$0xff]  ;;  %s2190_s29 = smov 64   ;;  %vm1490_vm5 = vcmask 523264   ;;  %vm1511_vm6 = vcmask 785408  }
  0x6f   :  { %1879 = vmatprep.subr.bf16.mxu0 %v1878_v3  ;;  %1748 = vmatprep.mubr.msk.f32.mxu1 %vm134_vm0, %v2365_v7  ;;  %v2372_v9 = vld [vmem:[%s2525_s1 + $0x8] sm:$0xff]  ;;  %v131_v11 = vld [vmem:[#allocation2] sm:$0xff]  ;;  %vm1585_vm7 = vcmask 1041408   ;;  %s2191_s17 = smov [#allocation13]  }
  0x70   :  { %1881 = vmatpush3.bf16.msra.mxu0 %v1878_v3  ;;  %1883 = vmatprep.subr.bf16.mxu1 %v1882_v6  ;;  %v1629_v16 = vld [vmem:[%s2528_s4] ss:$0 sm:$0xff]  ;;  %s1605_s11 = sshll.u32 %s2191_s17, 4  ;;  %s1606_s11 = int_to_ptr.vmem [resolvable:$true] %s1605_s11 }
  0x71   :  { %1885 = vmatpush3.bf16.msra.mxu1 %v1882_v6  ;;  %1751 = vmatprep.subr.mxu0 %v132_v8  ;;  %p2151_p7 = scmp.lt.s32.totalorder %s1606_s11, %s1606_s11 }
  0x73   :  { %1742 = vmatmul.mubr.msk.f32.vlgmr.msra.gmra.mrb[0].mxu0 %vm134_vm0, %v2372_v9 }
  0x74   :  { %1749 = vmatmul.mubr.msk.f32.vlgmr.msra.gmra.mrb[0].mxu1 %vm134_vm0, %v2377_v10  ;;  %1752 = vmatpush3.msra.mxu0 %v132_v8 }
  0x75   :  { %1753 = vmatprep.mubr.msk.f32.mxu0 %vm297_vm1, %v123_v0  ;;  %1759 = vmatprep.subr.mxu0 %v131_v11 }
  0x76   :  { %1771 = vmatprep.mubr.msk.f32.mxu1 %vm134_vm0, %v127_v2 }
  0x77   :  { %1754 = vmatmul.mubr.msk.f32.vlgmr.msra.gmra.mrb[2].mxu0 %vm297_vm1, %v124_v1 }
  0x78   :  { %1756 = vmatprep.mubr.msk.f32.mxu0 %vm297_vm1, %v125_v4  ;;  %1760 = vmatpush3.msra.mxu0 %v131_v11 }
  0x7b   :  { %1757 = vmatmul.mubr.msk.f32.gmra.mrb[4].mxu0 %vm297_vm1, %v126_v5 }
 0x146   :  { %v1743_v12 = vpop.f32.mrb[0].mxu0 }
 0x147   :  { %v207_v13 = vpop.f32.mrb[1].mxu0  ;;  %v1750_v14 = vpop.f32.mrb[0].mxu1 }
 0x148   :  { %1761 = vmatprep.mubr.msk.f32.mxu0 %vm297_vm1, %v207_v13  ;;  %v288_v15 = vpop.f32.mrb[1].mxu1 }
 0x149   :  { %1762 = vmatmul.mubr.msk.f32.vlgmr.msra.gmra.mrb[2].mxu0 %vm297_vm1, %v1743_v12 }
 0x14a   :  { %1764 = vmatprep.mubr.msk.f32.mxu0 %vm297_vm1, %v288_v15 }
 0x14d   :  { %1765 = vmatmul.mubr.msk.f32.gmra.mrb[4].mxu0 %vm297_vm1, %v1750_v14 }
 0x14e   :  { %1813 = vmatprep.mubr.msk.f32.mxu0 %vm134_vm0, %v127_v2 }
 0x21c   :  { %v1763_v17 = vpop.f32.mrb[2].mxu0 }
 0x21d   :  { %v473_v18 = vpop.f32.mrb[3].mxu0  ;;  %v499_v19 = vadd.f32 %v1763_v17, %v1629_v16 }
 0x21e   :  { %v498_v20 = vadd.f32 %v1629_v16, %v473_v18 }
 0x21f   :  { %v503_v27 = vmul.f32 %v499_v19, %v499_v19 }
 0x220   :  { %v1766_v21 = vpop.f32.mrb[4].mxu0  ;;  %v502_v22 = vmul.f32 %v498_v20, %v498_v20 }
 0x221   :  { %v483_v23 = vpop.f32.mrb[5].mxu0  ;;  %v501_v24 = vadd.f32 %v1766_v21, %v1629_v16  ;;  %v510_v29 = vsel %vm506_vm2, %v503_v27, 0.0 }
 0x222   :  { %v500_v25 = vadd.f32 %v1629_v16, %v483_v23  ;;  %v507_v26 = vsel %vm506_vm2, %v502_v22, 0.0 }
 0x223   :  { %508 = vadd.xlane.f32.xlu0 %v507_v26  ;;  %v505_v31 = vmul.f32 %v501_v24, %v501_v24 }
 0x224   :  { %v504_v28 = vmul.f32 %v500_v25, %v500_v25 }
 0x225   :  { %v516_v32 = vsel %vm506_vm2, %v505_v31, 0.0 }
 0x226   :  { %v513_v30 = vsel %vm506_vm2, %v504_v28, 0.0 }
 0x227   :  { %511 = vadd.xlane.f32.xlu0 %v510_v29  ;;  %514 = vadd.xlane.f32.xlu1 %v513_v30 }
 0x22b   :  { %517 = vadd.xlane.f32.xlu1 %v516_v32 }
 0x2b0   :  { %v509_v33 = vpop.xlane.xlu0 %508 }
 0x2b1   :  { %v519_v34 = vmax.f32 %v509_v33, 1e-24 }
 0x2b3   :  { %1978 = vrsqrt.f32 %v519_v34 }
 0x2b4   :  { %v512_v35 = vpop.xlane.xlu0 %511  ;;  %v515_v36 = vpop.xlane.xlu1 %514 }
 0x2b5   :  { %v520_v37 = vmax.f32 %v512_v35, 1e-24  ;;  %v521_v38 = vmax.f32 %v515_v36, 1e-24 }
 0x2b7   :  { %1980 = vrsqrt.f32 %v520_v37 }
 0x2b8   :  { %1982 = vrsqrt.f32 %v521_v38  ;;  %v518_v39 = vpop.xlane.xlu1 %517 }
 0x2b9   :  { %v522_v40 = vmax.f32 %v518_v39, 1e-24  ;;  %v606_v39 = vld [vmem:[#allocation7] sm:$0xff] }
 0x2bb   :  { %1984 = vrsqrt.f32 %v522_v40  ;;  %v607_v40 = vld [vmem:[#allocation7 + $0x8] sm:$0xff] }
 0x2bd   :  { %v1979_v41 = vpop.eup %1978 }
 0x2be   :  { %v527_v42 = vmul.f32 %v1979_v41, %v498_v20 }
 0x2c0   :  { %v531_v43 = vmax.f32 %v527_v42, 0.0 }
 0x2c1   :  { %v1981_v44 = vpop.eup %1980 }
 0x2c2   :  { %v1983_v45 = vpop.eup %1982  ;;  %v535_v46 = vsel %vm506_vm2, %v531_v43, 0.0  ;;  %v528_v47 = vmul.f32 %v1981_v44, %v499_v19  ;;  %v1894_v44 = vpack.c.bf16 %v607_v40, %v606_v39 }
 0x2c3   :  { %536 = vadd.xlane.f32.xlu0 %v535_v46  ;;  %v529_v48 = vmul.f32 %v1983_v45, %v500_v25  ;;  %v608_v45 = vld [vmem:[#allocation7 + $0x10] sm:$0xff]  ;;  %v609_v46 = vld [vmem:[#allocation7 + $0x18] sm:$0xff] }
 0x2c4   :  { %v532_v49 = vmax.f32 %v528_v47, 0.0 }
 0x2c5   :  { %v1985_v50 = vpop.eup %1984  ;;  %v533_v51 = vmax.f32 %v529_v48, 0.0 }
 0x2c6   :  { %v538_v52 = vsel %vm506_vm2, %v532_v49, 0.0  ;;  %v530_v53 = vmul.f32 %v1985_v50, %v501_v24 }
 0x2c7   :  { %539 = vadd.xlane.f32.xlu1 %v538_v52  ;;  %v541_v54 = vsel %vm506_vm2, %v533_v51, 0.0  ;;  %v602_v52 = vld [vmem:[%s2529_s5] sm:$0xff] }
 0x2c8   :  { %542 = vadd.xlane.f32.xlu0 %v541_v54  ;;  %v534_v55 = vmax.f32 %v530_v53, 0.0  ;;  %v603_v53 = vld [vmem:[%s2529_s5 + $0x8] sm:$0xff] }
 0x2ca   :  { %v544_v56 = vsel %vm506_vm2, %v534_v55, 0.0 }
 0x2cb   :  { %545 = vadd.xlane.f32.xlu1 %v544_v56 }
 0x350   :  { %v537_v57 = vpop.xlane.xlu0 %536 }
 0x354   :  { %v540_v58 = vpop.xlane.xlu1 %539 }
 0x355   :  { %v543_v59 = vpop.xlane.xlu0 %542 }
 0x356   :  { %v547_v60 = vadd.f32 %v543_v59, %v537_v57  ;;  %v604_v59 = vld [vmem:[%s2529_s5 + $0x10] sm:$0xff] }
 0x358   :  { %v550_v61 = vmul.f32 0.015625, %v547_v60  ;;  %v546_v62 = vpop.xlane.xlu1 %545  ;;  %v605_v60 = vld [vmem:[%s2529_s5 + $0x18] sm:$0xff] }
 0x359   :  { %v548_v63 = vadd.f32 %v546_v62, %v540_v58  ;;  %v1902_v58 = vpack.c.bf16 %v603_v53, %v602_v52 }
 0x35a   :  { %v552_v0 = vsub.f32 %v531_v43, %v550_v61  ;;  %v554_v1 = vsub.f32 %v533_v51, %v550_v61  ;;  %v1898_v51 = vpack.c.bf16 %v609_v46, %v608_v45 }
 0x35b   :  { %v551_v2 = vmul.f32 0.015625, %v548_v63 }
 0x35c   :  { %v556_v3 = vmul.f32 %v552_v0, %v552_v0  ;;  %v558_v8 = vmul.f32 %v554_v1, %v554_v1 }
 0x35d   :  { %v553_v4 = vsub.f32 %v532_v49, %v551_v2  ;;  %v555_v5 = vsub.f32 %v534_v55, %v551_v2 }
 0x35e   :  { %v560_v6 = vsel %vm506_vm2, %v556_v3, 0.0  ;;  %v566_v14 = vsel %vm506_vm2, %v558_v8, 0.0 }
 0x35f   :  { %561 = vadd.xlane.f32.xlu0 %v560_v6  ;;  %v557_v11 = vmul.f32 %v553_v4, %v553_v4  ;;  %v559_v13 = vmul.f32 %v555_v5, %v555_v5 }
 0x361   :  { %v563_v12 = vsel %vm506_vm2, %v557_v11, 0.0  ;;  %v569_v15 = vsel %vm506_vm2, %v559_v13, 0.0 }
 0x362   :  { %564 = vadd.xlane.f32.xlu1 %v563_v12 }
 0x363   :  { %567 = vadd.xlane.f32.xlu0 %v566_v14 }
 0x366   :  { %570 = vadd.xlane.f32.xlu1 %v569_v15 }
 0x3ec   :  { %v562_v16 = vpop.xlane.xlu0 %561 }
 0x3ef   :  { %v565_v17 = vpop.xlane.xlu1 %564 }
 0x3f0   :  { %v568_v18 = vpop.xlane.xlu0 %567 }
 0x3f1   :  { %v572_v19 = vadd.f32 %v568_v18, %v562_v16 }
 0x3f3   :  { %v574_v20 = vmul.f32 0.015625, %v572_v19  ;;  %v571_v21 = vpop.xlane.xlu1 %570 }
 0x3f4   :  { %v573_v22 = vadd.f32 %v571_v21, %v565_v17 }
 0x3f5   :  { %v576_v23 = vadd.f32 1e-05, %v574_v20 }
 0x3f6   :  { %v575_v24 = vmul.f32 0.015625, %v573_v22 }
 0x3f7   :  { %1986 = vrsqrt.f32 %v576_v23 }
 0x3f8   :  { %v577_v25 = vadd.f32 1e-05, %v575_v24 }
 0x3fa   :  { %1988 = vrsqrt.f32 %v577_v25 }
 0x401   :  { %v1987_v26 = vpop.eup %1986 }
 0x402   :  { %v580_v27 = vmul.f32 %v1987_v26, %v552_v0  ;;  %v582_v28 = vmul.f32 %v1987_v26, %v554_v1  ;;  %v1906_v0 = vpack.c.bf16 %v605_v60, %v604_v59 }
 0x404   :  { %v1989_v29 = vpop.eup %1988  ;;  %v584_v32 = vsel %vm506_vm2, %v580_v27, -inf  ;;  %v593_v35 = vsel %vm506_vm2, %v582_v28, -inf }
 0x405   :  { %v581_v30 = vmul.f32 %v1989_v29, %v553_v4  ;;  %v583_v31 = vmul.f32 %v1989_v29, %v555_v5  ;;  %v1642_v5 = vld [vmem:[%s2531_s7] ss:$0 sm:$0xff] }
 0x407   :  { %v585_v33 = vsel %vm506_vm2, %v581_v30, -inf  ;;  %v1886_v34 = vpack.c.bf16 %v581_v30, %v580_v27  ;;  %v594_v36 = vsel %vm506_vm2, %v583_v31, -inf  ;;  %v1890_v41 = vpack.c.bf16 %v583_v31, %v582_v28 }
 0x408   :  { %v586_v37 = vmax.f32 %v584_v32, %v585_v33  ;;  %v595_v38 = vmax.f32 %v593_v35, %v594_v36 }
 0x409   :  { %1887 = vmatprep.subr.bf16.mxu1 %v1886_v34 }
 0x40a   :  { %1889 = vmatpush3.bf16.msra.mxu1 %v1886_v34  ;;  %v596_v42 = vrot.slane %v595_v38, 4  ;;  %v587_v43 = vrot.slane %v586_v37, 4 }
 0x40b   :  { %1891 = vmatprep.subr.bf16.mxu1 %v1890_v41 }
 0x40c   :  { %v597_v47 = vmax.f32 %v595_v38, %v596_v42  ;;  %v588_v48 = vmax.f32 %v586_v37, %v587_v43 }
 0x40d   :  { %1772 = vmatmul.mubr.msk.f32.vlgmr.msra.gmra.mrb[2].mxu1 %vm134_vm0, %v2372_v9 }
 0x40e   :  { %1893 = vmatpush3.bf16.msra.mxu1 %v1890_v41  ;;  %1778 = vmatprep.mubr.msk.f32.mxu1 %vm134_vm0, %v2365_v7  ;;  %v598_v49 = vrot.slane %v597_v47, 2  ;;  %v589_v50 = vrot.slane %v588_v48, 2 }
 0x40f   :  { %1895 = vmatprep.subr.bf16.mxu1 %v1894_v44 }
 0x410   :  { %v599_v54 = vmax.f32 %v597_v47, %v598_v49  ;;  %v590_v55 = vmax.f32 %v588_v48, %v589_v50 }
 0x411   :  { %1779 = vmatmul.mubr.msk.f32.vlgmr.msra.gmra.mrb[4].mxu1 %vm134_vm0, %v2377_v10 }
 0x412   :  { %1897 = vmatpush3.bf16.msra.mxu1 %v1894_v44  ;;  %1789 = vmatprep.mubr.msk.f32.mxu1 %vm506_vm2, %v580_v27  ;;  %v600_v56 = vrot.slane %v599_v54, 1  ;;  %v591_v57 = vrot.slane %v590_v55, 1 }
 0x413   :  { %1899 = vmatprep.subr.bf16.mxu1 %v1898_v51 }
 0x414   :  { %v601_v61 = vmax.f32 %v599_v54, %v600_v56  ;;  %v592_v62 = vmax.f32 %v590_v55, %v591_v57 }
 0x416   :  { %1901 = vmatpush3.bf16.msra.mxu1 %v1898_v51  ;;  %v2432_v63 = vsel %vm1474_vm3, %v601_v61, %v592_v62 }
 0x417   :  { %1903 = vmatprep.subr.bf16.mxu1 %v1902_v58 }
 0x419   :  { %1790 = vmatmul.mubr.msk.f32.vlgmr.msra.gmra.mrb[6].mxu1 %vm506_vm2, %v581_v30 }
 0x41a   :  { %1792 = vmatprep.mubr.msk.f32.mxu1 %vm506_vm2, %v582_v28  ;;  %1905 = vmatpush3.bf16.msra.mxu1 %v1902_v58 }
 0x41b   :  { %1907 = vmatprep.subr.bf16.mxu1 %v1906_v0 }
 0x41d   :  { %1793 = vmatmul.mubr.msk.f32.gmra.mrb[8].mxu1 %vm506_vm2, %v583_v31 }
 0x41e   :  { %1909 = vmatpush3.bf16.msra.mxu1 %v1906_v0 }
 0x4e0   :  { %v1773_v1 = vpop.f32.mrb[2].mxu1 }
 0x4e1   :  { %v677_v2 = vpop.f32.mrb[3].mxu1 }
 0x4e2   :  { %1803 = vmatprep.mubr.msk.f32.mxu1 %vm506_vm2, %v677_v2 }
 0x4e3   :  { %1804 = vmatmul.mubr.msk.f32.vlgmr.msra.gmra.mrb[6].mxu1 %vm506_vm2, %v1773_v1 }
 0x4e4   :  { %v1780_v3 = vpop.f32.mrb[4].mxu1 }
 0x4e5   :  { %v752_v4 = vpop.f32.mrb[5].mxu1 }
 0x4e6   :  { %1806 = vmatprep.mubr.msk.f32.mxu1 %vm506_vm2, %v752_v4 }
 0x4e7   :  { %1807 = vmatmul.mubr.msk.f32.gmra.mrb[8].mxu1 %vm506_vm2, %v1780_v3 }
 0x5b6   :  { %v1805_v6 = vpop.f32.mrb[6].mxu1 }
 0x5b7   :  { %v962_v8 = vadd.f32 %v1805_v6, %v1642_v5  ;;  %v936_v11 = vpop.f32.mrb[7].mxu1 }
 0x5b8   :  { %v961_v12 = vadd.f32 %v1642_v5, %v936_v11 }
 0x5b9   :  { %v966_v13 = vmul.f32 %v962_v8, %v962_v8 }
 0x5ba   :  { %v1808_v14 = vpop.f32.mrb[8].mxu1  ;;  %v965_v15 = vmul.f32 %v961_v12, %v961_v12 }
 0x5bb   :  { %v964_v16 = vadd.f32 %v1808_v14, %v1642_v5  ;;  %v946_v17 = vpop.f32.mrb[9].mxu1  ;;  %v972_v18 = vsel %vm506_vm2, %v966_v13, 0.0 }
 0x5bc   :  { %v963_v19 = vadd.f32 %v1642_v5, %v946_v17  ;;  %973 = vadd.xlane.f32.xlu1 %v972_v18  ;;  %v969_v20 = vsel %vm506_vm2, %v965_v15, 0.0 }
 0x5bd   :  { %970 = vadd.xlane.f32.xlu0 %v969_v20  ;;  %v968_v21 = vmul.f32 %v964_v16, %v964_v16 }
 0x5be   :  { %v967_v22 = vmul.f32 %v963_v19, %v963_v19 }
 0x5bf   :  { %v978_v23 = vsel %vm506_vm2, %v968_v21, 0.0 }
 0x5c0   :  { %979 = vadd.xlane.f32.xlu1 %v978_v23  ;;  %v975_v24 = vsel %vm506_vm2, %v967_v22, 0.0 }
 0x5c1   :  { %976 = vadd.xlane.f32.xlu0 %v975_v24 }
 0x649   :  { %v974_v25 = vpop.xlane.xlu1 %973 }
 0x64a   :  { %v982_v26 = vmax.f32 %v974_v25, 1e-24  ;;  %v971_v27 = vpop.xlane.xlu0 %970 }
 0x64b   :  { %v981_v28 = vmax.f32 %v971_v27, 1e-24 }
 0x64c   :  { %1990 = vrsqrt.f32 %v982_v26 }
 0x64d   :  { %1992 = vrsqrt.f32 %v981_v28  ;;  %v980_v29 = vpop.xlane.xlu1 %979 }
 0x64e   :  { %v984_v30 = vmax.f32 %v980_v29, 1e-24  ;;  %v977_v31 = vpop.xlane.xlu0 %976 }
 0x64f   :  { %v983_v32 = vmax.f32 %v977_v31, 1e-24  ;;  %v1068_v31 = vld [vmem:[#allocation10 + $0x8] sm:$0xff] }
 0x650   :  { %1994 = vrsqrt.f32 %v984_v30  ;;  %v1067_v30 = vld [vmem:[#allocation10] sm:$0xff] }
 0x651   :  { %1996 = vrsqrt.f32 %v983_v32 }
 0x656   :  { %v1991_v33 = vpop.eup %1990 }
 0x657   :  { %v1993_v34 = vpop.eup %1992  ;;  %v990_v35 = vmul.f32 %v1991_v33, %v962_v8 }
 0x658   :  { %v989_v36 = vmul.f32 %v1993_v34, %v961_v12 }
 0x659   :  { %v994_v37 = vmax.f32 %v990_v35, 0.0 }
 0x65a   :  { %v1995_v38 = vpop.eup %1994  ;;  %v993_v39 = vmax.f32 %v989_v36, 0.0 }
 0x65b   :  { %v1997_v40 = vpop.eup %1996  ;;  %v1000_v41 = vsel %vm506_vm2, %v994_v37, 0.0  ;;  %v992_v42 = vmul.f32 %v1995_v38, %v964_v16  ;;  %v1069_v38 = vld [vmem:[#allocation10 + $0x10] sm:$0xff] }
 0x65c   :  { %1001 = vadd.xlane.f32.xlu1 %v1000_v41  ;;  %v997_v43 = vsel %vm506_vm2, %v993_v39, 0.0  ;;  %v991_v44 = vmul.f32 %v1997_v40, %v963_v19 }
 0x65d   :  { %998 = vadd.xlane.f32.xlu0 %v997_v43  ;;  %v996_v45 = vmax.f32 %v992_v42, 0.0 }
 0x65e   :  { %v995_v46 = vmax.f32 %v991_v44, 0.0 }
 0x65f   :  { %v1006_v47 = vsel %vm506_vm2, %v996_v45, 0.0 }
 0x660   :  { %1007 = vadd.xlane.f32.xlu1 %v1006_v47  ;;  %v1003_v48 = vsel %vm506_vm2, %v995_v46, 0.0 }
 0x661   :  { %1004 = vadd.xlane.f32.xlu0 %v1003_v48 }
 0x6e9   :  { %v1002_v49 = vpop.xlane.xlu1 %1001 }
 0x6ea   :  { %v999_v50 = vpop.xlane.xlu0 %998 }
 0x6ed   :  { %v1008_v51 = vpop.xlane.xlu1 %1007 }
 0x6ee   :  { %v1010_v52 = vadd.f32 %v1008_v51, %v1002_v49  ;;  %v1005_v53 = vpop.xlane.xlu0 %1004  ;;  %v1065_v51 = vld [vmem:[#allocation8 + $0x10] sm:$0xff] }
 0x6ef   :  { %v1009_v54 = vadd.f32 %v1005_v53, %v999_v50 }
 0x6f0   :  { %v1012_v55 = vmul.f32 0.015625, %v1010_v52 }
 0x6f1   :  { %v1011_v56 = vmul.f32 0.015625, %v1009_v54 }
 0x6f2   :  { %v1014_v57 = vsub.f32 %v994_v37, %v1012_v55  ;;  %v1016_v58 = vsub.f32 %v996_v45, %v1012_v55  ;;  %v1918_v37 = vpack.c.bf16 %v1068_v31, %v1067_v30  ;;  %v1063_v45 = vld [vmem:[#allocation8] sm:$0xff]  ;;  %v1501_v30 = vld [vmem:[#allocation11 + $0x48] sm:$0xff] }
 0x6f3   :  { %v1013_v59 = vsub.f32 %v993_v39, %v1011_v56  ;;  %v1015_v60 = vsub.f32 %v995_v46, %v1011_v56  ;;  %v1070_v39 = vld [vmem:[#allocation10 + $0x18] sm:$0xff]  ;;  %v1064_v46 = vld [vmem:[#allocation8 + $0x8] sm:$0xff] }
 0x6f4   :  { %v1018_v61 = vmul.f32 %v1014_v57, %v1014_v57  ;;  %v1020_v1 = vmul.f32 %v1016_v58, %v1016_v58  ;;  %v1922_v44 = vpack.c.bf16 %v1070_v39, %v1069_v38  ;;  %v1926_v50 = vpack.c.bf16 %v1064_v46, %v1063_v45 }
 0x6f5   :  { %v1017_v62 = vmul.f32 %v1013_v59, %v1013_v59  ;;  %v1019_v3 = vmul.f32 %v1015_v60, %v1015_v60 }
 0x6f6   :  { %v1024_v0 = vsel %vm506_vm2, %v1018_v61, 0.0  ;;  %v1030_v4 = vsel %vm506_vm2, %v1020_v1, 0.0 }
 0x6f7   :  { %1025 = vadd.xlane.f32.xlu1 %v1024_v0  ;;  %v1021_v2 = vsel %vm506_vm2, %v1017_v62, 0.0  ;;  %v1027_v5 = vsel %vm506_vm2, %v1019_v3, 0.0 }
 0x6f8   :  { %1022 = vadd.xlane.f32.xlu0 %v1021_v2 }
 0x6fb   :  { %1031 = vadd.xlane.f32.xlu1 %v1030_v4 }
 0x6fc   :  { %1028 = vadd.xlane.f32.xlu0 %v1027_v5 }
 0x784   :  { %v1026_v6 = vpop.xlane.xlu1 %1025 }
 0x785   :  { %v1023_v8 = vpop.xlane.xlu0 %1022 }
 0x788   :  { %v1032_v11 = vpop.xlane.xlu1 %1031 }
 0x789   :  { %v1034_v12 = vadd.f32 %v1032_v11, %v1026_v6  ;;  %v1029_v13 = vpop.xlane.xlu0 %1028 }
 0x78a   :  { %v1033_v14 = vadd.f32 %v1029_v13, %v1023_v8 }
 0x78b   :  { %v1036_v15 = vmul.f32 0.015625, %v1034_v12 }
 0x78c   :  { %v1035_v16 = vmul.f32 0.015625, %v1033_v14 }
 0x78d   :  { %v1038_v17 = vadd.f32 1e-05, %v1036_v15 }
 0x78e   :  { %v1037_v18 = vadd.f32 1e-05, %v1035_v16  ;;  %v1492_v16 = vld [vmem:[#allocation11] sm:$0xff] }
 0x78f   :  { %1998 = vrsqrt.f32 %v1038_v17  ;;  %v1493_v17 = vld [vmem:[#allocation11 + $0x8] sm:$0xff] }
 0x790   :  { %2000 = vrsqrt.f32 %v1037_v18  ;;  %v1494_v18 = vld [vmem:[#allocation11 + $0x10] sm:$0xff] }
 0x799   :  { %v1999_v19 = vpop.eup %1998 }
 0x79a   :  { %v2001_v20 = vpop.eup %2000  ;;  %v1042_v21 = vmul.f32 %v1999_v19, %v1014_v57  ;;  %v1044_v22 = vmul.f32 %v1999_v19, %v1016_v58  ;;  %v2187_v19 = vmov 0.0|0.0  }
 0x79b   :  { %v1041_v23 = vmul.f32 %v2001_v20, %v1013_v59  ;;  %v1043_v24 = vmul.f32 %v2001_v20, %v1015_v60  ;;  %v1655_v59 = vld [vmem:[%s2534_s10] ss:$0 sm:$0xff]  ;;  %s2186_s10 = smov 32   ;;  %1934 = vmatprep.subr.bf16.mxu1 %v2187_v19  ;;  %v1935_v20 = vpack.c.bf16 %v1493_v17, %v1492_v16 }
 0x79c   :  { %v1046_v25 = vsel %vm506_vm2, %v1042_v21, -inf  ;;  %v1055_v26 = vsel %vm506_vm2, %v1044_v22, -inf }
 0x79d   :  { %v1045_v27 = vsel %vm506_vm2, %v1041_v23, -inf  ;;  %v1910_v28 = vpack.c.bf16 %v1042_v21, %v1041_v23  ;;  %v1054_v29 = vsel %vm506_vm2, %v1043_v24, -inf  ;;  %v1914_v34 = vpack.c.bf16 %v1044_v22, %v1043_v24  ;;  %1936 = vmatpush3.bf16.msra.mxu1 %v1935_v20 }
 0x79e   :  { %v1047_v32 = vmax.f32 %v1045_v27, %v1046_v25  ;;  %v1056_v33 = vmax.f32 %v1054_v29, %v1055_v26  ;;  %1937 = vmatprep.subr.bf16.mxu1 %v2187_v19  ;;  %v1498_v26 = vld [vmem:[#allocation11 + $0x30] sm:$0xff]  ;;  %v1499_v27 = vld [vmem:[#allocation11 + $0x38] sm:$0xff]  ;;  %v1500_v29 = vld [vmem:[#allocation11 + $0x40] sm:$0xff] }
 0x79f   :  { %1911 = vmatprep.subr.bf16.mxu0 %v1910_v28  ;;  %v1947_v31 = vpack.c.bf16 %v1501_v30, %v1500_v29 }
 0x7a0   :  { %1913 = vmatpush3.bf16.msra.mxu0 %v1910_v28  ;;  %v1048_v35 = vrot.slane %v1047_v32, 4  ;;  %v1057_v36 = vrot.slane %v1056_v33, 4  ;;  %v1944_v28 = vpack.c.bf16 %v1499_v27, %v1498_v26 }
 0x7a1   :  { %1915 = vmatprep.subr.bf16.mxu0 %v1914_v34 }
 0x7a2   :  { %v1049_v40 = vmax.f32 %v1047_v32, %v1048_v35  ;;  %v1058_v41 = vmax.f32 %v1056_v33, %v1057_v36  ;;  %v1502_v32 = vld [vmem:[#allocation11 + $0x50] sm:$0xff]  ;;  %v1503_v33 = vld [vmem:[#allocation11 + $0x58] sm:$0xff] }
 0x7a3   :  { %1814 = vmatmul.mubr.msk.f32.vlgmr.msra.gmra.mrb[6].mxu0 %vm134_vm0, %v2372_v9 }
 0x7a4   :  { %1917 = vmatpush3.bf16.msra.mxu0 %v1914_v34  ;;  %1820 = vmatprep.mubr.msk.f32.mxu0 %vm134_vm0, %v2365_v7  ;;  %v1050_v42 = vrot.slane %v1049_v40, 2  ;;  %v1059_v43 = vrot.slane %v1058_v41, 2  ;;  %v1066_v7 = vld [vmem:[#allocation8 + $0x18] sm:$0xff]  ;;  %v1950_v34 = vpack.c.bf16 %v1503_v33, %v1502_v32 }
 0x7a5   :  { %1919 = vmatprep.subr.bf16.mxu0 %v1918_v37  ;;  %v1930_v55 = vpack.c.bf16 %v1066_v7, %v1065_v51 }
 0x7a6   :  { %v1051_v47 = vmax.f32 %v1049_v40, %v1050_v42  ;;  %v1060_v48 = vmax.f32 %v1058_v41, %v1059_v43 }
 0x7a7   :  { %1821 = vmatmul.mubr.msk.f32.vlgmr.msra.gmra.mrb[8].mxu0 %vm134_vm0, %v2377_v10 }
 0x7a8   :  { %1921 = vmatpush3.bf16.msra.mxu0 %v1918_v37  ;;  %1831 = vmatprep.mubr.msk.f32.mxu0 %vm506_vm2, %v1041_v23  ;;  %v1052_v49 = vrot.slane %v1051_v47, 1  ;;  %v1061_v9 = vrot.slane %v1060_v48, 1  ;;  %v1496_v23 = vld [vmem:[#allocation11 + $0x20] sm:$0xff] }
 0x7a9   :  { %1923 = vmatprep.subr.bf16.mxu0 %v1922_v44 }
 0x7aa   :  { %v1053_v52 = vmax.f32 %v1051_v47, %v1052_v49  ;;  %v1062_v53 = vmax.f32 %v1060_v48, %v1061_v9 }
 0x7ac   :  { %1925 = vmatpush3.bf16.msra.mxu0 %v1922_v44  ;;  %v1479_v54 = vsel %vm1474_vm3, %v1062_v53, %v1053_v52 }
 0x7ad   :  { %1927 = vmatprep.subr.bf16.mxu0 %v1926_v50 }
 0x7af   :  { %1832 = vmatmul.mubr.msk.f32.vlgmr.msra.gmra.mrb[10].mxu0 %vm506_vm2, %v1042_v21  ;;  %v1495_v21 = vld [vmem:[#allocation11 + $0x18] sm:$0xff] }
 0x7b0   :  { %1834 = vmatprep.mubr.msk.f32.mxu0 %vm506_vm2, %v1043_v24  ;;  %1929 = vmatpush3.bf16.msra.mxu0 %v1926_v50  ;;  %v1497_v24 = vld [vmem:[#allocation11 + $0x28] sm:$0xff] }
 0x7b1   :  { %1931 = vmatprep.subr.bf16.mxu0 %v1930_v55  ;;  %v1941_v25 = vpack.c.bf16 %v1497_v24, %v1496_v23 }
 0x7b3   :  { %1835 = vmatmul.mubr.msk.f32.gmra.mrb[12].mxu0 %vm506_vm2, %v1044_v22  ;;  %v1938_v22 = vpack.c.bf16 %v1495_v21, %v1494_v18 }
 0x7b4   :  { %1933 = vmatpush3.bf16.msra.mxu0 %v1930_v55 }
 0x7b5   :  { %1939 = vmatpush3.bf16.msra.mxu1 %v1938_v22 }
 0x7b6   :  { %1940 = vmatprep.subr.bf16.mxu1 %v2187_v19 }
 0x7b9   :  { %1942 = vmatpush3.bf16.msra.mxu1 %v1941_v25 }
 0x7ba   :  { %1943 = vmatprep.subr.bf16.mxu1 %v2187_v19 }
 0x7bd   :  { %1945 = vmatpush3.bf16.msra.mxu1 %v1944_v28 }
 0x7be   :  { %1946 = vmatprep.subr.bf16.mxu1 %v2187_v19 }
 0x7c1   :  { %1948 = vmatpush3.bf16.msra.mxu1 %v1947_v31 }
 0x7c2   :  { %1949 = vmatprep.subr.bf16.mxu1 %v2187_v19 }
 0x7c5   :  { %1951 = vmatpush3.bf16.msra.mxu1 %v1950_v34 }
 0x876   :  { %v1815_v10 = vpop.f32.mrb[6].mxu0 }
 0x877   :  { %v1138_v56 = vpop.f32.mrb[7].mxu0 }
 0x878   :  { %1845 = vmatprep.mubr.msk.f32.mxu0 %vm506_vm2, %v1138_v56 }
 0x879   :  { %1846 = vmatmul.mubr.msk.f32.vlgmr.msra.gmra.mrb[10].mxu0 %vm506_vm2, %v1815_v10 }
 0x87a   :  { %v1822_v57 = vpop.f32.mrb[8].mxu0 }
 0x87b   :  { %v1213_v58 = vpop.f32.mrb[9].mxu0 }
 0x87c   :  { %1848 = vmatprep.mubr.msk.f32.mxu0 %vm506_vm2, %v1213_v58  ;;  %v2189_v58 = vmov 0.0  }
 0x87d   :  { %1849 = vmatmul.mubr.msk.f32.gmra.mrb[12].mxu0 %vm506_vm2, %v1822_v57  ;;  %1875 = vmatprep.mubr.msk.f32.mxu1 %vm2188_vm4, %v2189_v58 }
 0x94c   :  { %v1847_v60 = vpop.f32.mrb[10].mxu0 }
 0x94d   :  { %v2478_v61 = vadd.f32 %v1847_v60, %v1655_v59  ;;  %v1397_v62 = vpop.f32.mrb[11].mxu0 }
 0x94e   :  { %v2480_v0 = vadd.f32 %v1655_v59, %v1397_v62 }
 0x94f   :  { %v1427_v1 = vmul.f32 %v2478_v61, %v2478_v61 }
 0x950   :  { %v1850_v2 = vpop.f32.mrb[12].mxu0  ;;  %v1426_v3 = vmul.f32 %v2480_v0, %v2480_v0 }
 0x951   :  { %v2486_v4 = vadd.f32 %v1850_v2, %v1655_v59  ;;  %v1407_v5 = vpop.f32.mrb[13].mxu0  ;;  %v1433_v6 = vsel %vm506_vm2, %v1427_v1, 0.0 }
 0x952   :  { %v2489_v8 = vadd.f32 %v1655_v59, %v1407_v5  ;;  %1434 = vadd.xlane.f32.xlu1 %v1433_v6  ;;  %v1430_v11 = vsel %vm506_vm2, %v1426_v3, 0.0 }
 0x953   :  { %1431 = vadd.xlane.f32.xlu0 %v1430_v11  ;;  %v1429_v12 = vmul.f32 %v2486_v4, %v2486_v4 }
 0x954   :  { %v1428_v13 = vmul.f32 %v2489_v8, %v2489_v8 }
 0x955   :  { %v1439_v14 = vsel %vm506_vm2, %v1429_v12, 0.0  ;;  %v1656_v12 = vld [vmem:[%s2536_s12] ss:$0 sm:$0xff]  ;;  %s2146_s12 = scalar_lea.vmem %s1606_s11, 32 }
 0x956   :  { %1440 = vadd.xlane.f32.xlu1 %v1439_v14  ;;  %v1436_v15 = vsel %vm506_vm2, %v1428_v13, 0.0  ;;  %p2147_p6 = scmp.ne.s32.totalorder %s1606_s11, %s2146_s12  ;;  %p2152_p8 = scmp.lt.s32.totalorder %s2146_s12, %s2146_s12 }
 0x957   :  { %1437 = vadd.xlane.f32.xlu0 %v1436_v15 }
 0x958   :  { %p2153_p9 = por %p2152_p8, %p2151_p7 }
 0x95a   :  { %p2154_p10 = pnand %p2153_p9, %p2147_p6 }
 0x96d   :  { %1480 = vrot.lane.b32.xlu0 %v1479_v54, %s2186_s10 }
 0x9df   :  { %v1435_v35 = vpop.xlane.xlu1 %1434 }
 0x9e0   :  { %v1443_v36 = vmax.f32 %v1435_v35, 1e-24  ;;  %v1432_v37 = vpop.xlane.xlu0 %1431 }
 0x9e1   :  { %v1442_v38 = vmax.f32 %v1432_v37, 1e-24 }
 0x9e2   :  { %2002 = vrsqrt.f32 %v1443_v36 }
 0x9e3   :  { %2004 = vrsqrt.f32 %v1442_v38  ;;  %v1441_v39 = vpop.xlane.xlu1 %1440 }
 0x9e4   :  { %v1445_v40 = vmax.f32 %v1441_v39, 1e-24  ;;  %v1438_v41 = vpop.xlane.xlu0 %1437 }
 0x9e5   :  { %v1444_v42 = vmax.f32 %v1438_v41, 1e-24 }
 0x9e6   :  { %2006 = vrsqrt.f32 %v1445_v40 }
 0x9e7   :  { %2008 = vrsqrt.f32 %v1444_v42 }
 0x9e8   :  { %v1481_v5 = vpop.permute.xlu0 %1480 }
 0x9e9   :  { %v1489_v6 = vsel %vm506_vm2, %v2432_v63, %v1481_v5 }
 0x9ec   :  { %v2003_v43 = vpop.eup %2002 }
 0x9ed   :  { %v2005_v44 = vpop.eup %2004  ;;  %v1451_v45 = vmul.f32 %v2003_v43, %v2478_v61 }
 0x9ee   :  { %v1450_v46 = vmul.f32 %v2005_v44, %v2480_v0 }
 0x9ef   :  { %v1455_v47 = vsel %vm506_vm2, %v1451_v45, -inf }
 0x9f0   :  { %v2007_v48 = vpop.eup %2006  ;;  %v1454_v49 = vsel %vm506_vm2, %v1450_v46, -inf }
 0x9f1   :  { %v2009_v9 = vpop.eup %2008  ;;  %v1453_v50 = vmul.f32 %v2007_v48, %v2486_v4  ;;  %v1456_v51 = vmax.f32 %v1454_v49, %v1455_v47 }
 0x9f2   :  { %v1452_v7 = vmul.f32 %v2009_v9, %v2489_v8 }
 0x9f3   :  { %v1457_v52 = vrot.slane %v1456_v51, 4  ;;  %v1464_v53 = vsel %vm506_vm2, %v1453_v50, -inf }
 0x9f4   :  { %v1463_v54 = vsel %vm506_vm2, %v1452_v7, -inf }
 0x9f5   :  { %v1458_v55 = vmax.f32 %v1456_v51, %v1457_v52  ;;  %v1465_v10 = vmax.f32 %v1463_v54, %v1464_v53 }
 0x9f7   :  { %v1459_v56 = vrot.slane %v1458_v55, 2  ;;  %v1466_v57 = vrot.slane %v1465_v10, 4 }
 0x9f9   :  { %v1460_v59 = vmax.f32 %v1458_v55, %v1459_v56  ;;  %v1467_v60 = vmax.f32 %v1465_v10, %v1466_v57 }
 0x9fb   :  { %v1468_v61 = vrot.slane %v1467_v60, 2  ;;  %v1461_v62 = vrot.slane %v1460_v59, 1 }
 0x9fd   :  { %v1469_v0 = vmax.f32 %v1467_v60, %v1468_v61  ;;  %v1462_v2 = vmax.f32 %v1460_v59, %v1461_v62 }
 0x9ff   :  { %v1470_v1 = vrot.slane %v1469_v0, 1 }
 0xa01   :  { %v1471_v3 = vmax.f32 %v1469_v0, %v1470_v1 }
 0xa03   :  { %v1485_v4 = vsel %vm1474_vm3, %v1471_v3, %v1462_v2 }
 0xa04   :  { %1486 = vrot.lane.b32.xlu1 %v1485_v4, %s2190_s29 }
 0xa76   :  { %v1487_v8 = vpop.permute.xlu1 %1486 }
 0xa77   :  { %v1491_v11 = vsel %vm1490_vm5, %v1489_v6, %v1487_v8 }
 0xa78   :  { %1876 = vmatmul.mubr.msk.f32.vlgmr.msra.gmra.mrb[10].mxu1 %vm1511_vm6, %v1491_v11 }
 0xb4b   :  { %v1581_v13 = vpop.f32.mrb[10].mxu1 }
 0xb4c   :  { %v1582_v14 = vadd.f32 %v1656_v12, %v1581_v13  ;;  %v1877_v15 = vpop.f32.mrb[11].mxu1 }
 0xb4e   :  { %v1586_v16 = vsel %vm1585_vm7, %v1582_v14, -inf }
 0xb4f   :  { %1587 = vmax.xlane.f32.xlu1 %v1586_v16 }
 0xbdc   :  { %v1588_v17 = vpop.xlane.xlu1 %1587 }
 0xbdd   :  { %v1589_v18 = vsub.f32 %v1582_v14, %v1588_v17 }
 0xbdf   :  { %v1590_v19 = vmul.f32 1.442695, %v1589_v18 }
 0xbe1   :  { %2010 = vpow2.f32 %v1590_v19 }
 0xbeb   :  { %v2011_v20 = vpop.eup %2010 }
 0xbec   :  { %v1592_v21 = vsel %vm1585_vm7, %v2011_v20, 0.0 }
 0xbed   :  { %1593 = vadd.xlane.f32.xlu0 %v1592_v21 }
 0xc7a   :  { %v1594_v63 = vpop.xlane.xlu0 %1593 }
 0xc7b   :  { %2012 = vlog2.f32 %v1594_v63 }
 0xc85   :  { %v2013_v22 = vpop.eup %2012 }
 0xc86   :  { %v1596_v23 = vmul.f32 0.6931472, %v2013_v22 }
 0xc88   :  { %v1597_v24 = vsub.f32 %v1589_v18, %v1596_v23 }
 0xc8a   :  { %1598 = vst [vmem:[#allocation13] sm:$0x3] %v1597_v24 }
 0xc8b   :  { %2157 = shalt.err (!%p2154_p10)
}
 0xc8c   :  { %s2158_s6 = scalar_lea.hbm %s2537_s13, 32 }
 0xc8d   :  { %p2159_p11 = scmp.ne.s32.totalorder %s2537_s13, %s2158_s6  ;;  %p2162_p12 = scmp.lt.u32.totalorder %s2158_s6, %s2537_s13 }
 0xc8f   :  { %p2164_p13 = pnand %p2162_p12, %p2159_p11 }
 0xc91   :  { %2167 = shalt.err (!%p2164_p13)
}
 0xc92   :  { %1608 = dma.vmem_to_hbm [thread:$0]  %s1606_s11, 32, %s2537_s13, [#allocation4]  }
 0xc93   :  { %2176 = dma.done.wait [#allocation4], 32  }
 0xc94   :  { %2177 = vsyncadd [#allocation4], 4294967264 }
 0xc95   :  { %1612 = vsyncpa [#allocation3], 1 }
 0xc96   :  { %1613 = vsyncpa [#allocation6], 1 }
 0xc97   :  { %1614 = vsyncpa [#allocation9], 1 }
 0xc98   :  { %1615 = vsyncpa [#allocation12], 1 }
 0xc99   :  { %1616 = vsyncpa [#allocation4], 1 }

</bundles_post_ra>
